<compile_context>
chip_gen: v6e
topology: v6e:2x2x1
jax: 0.10.0
libtpu: 0.0.40
codegen_flags: <defaults>
</compile_context>

<pallas_src>
import math

import jax
import jax.numpy as jnp
from jax.experimental import pallas as pl
from jax.experimental.pallas import tpu as pltpu

_LANES = 128
_TARGET_BLOCK_BYTES = 1 << 20          # ~1 MiB per student/teacher block
_VMEM_LIMIT_BYTES = 32 * 1024 * 1024   # headroom for double-buffered big blocks (v5e default is 16 MiB)


def _largest_divisor_leq(n, cap):
    cap = max(1, min(cap, n))
    for d in range(cap, 0, -1):
        if n % d == 0:
            return d
    return 1


def _make_kernel(NC, GC, S, SB, NS, mult, tail):
    """Kernel over blocks (BB, NC, SB) of student/teacher and (BB, GC, SB) of gt."""

    def kernel(s_ref, t_ref, g_ref, osum_ref, ocnt_ref, acc_sum, acc_cnt):
        j = pl.program_id(1)                      # spatial (reduction) axis

        @pl.when(j == 0)
        def _init():
            acc_sum[...] = jnp.zeros_like(acc_sum)
            acc_cnt[...] = jnp.zeros_like(acc_cnt)

        s = s_ref[...].astype(jnp.float32)        # upcast in-register only
        t = t_ref[...].astype(jnp.float32)
        g = g_ref[...]

        valid = g > 0                             # (BB, GC, SB) bool
        if tail:
            # Ragged last spatial block (only reached with BB == 1): mask lanes past S.
            col = jax.lax.broadcasted_iota(jnp.int32, (1, GC, SB), 2)
            valid = jnp.logical_and(valid, col < (S - j * SB))

        diff = s - t
        sq = diff * diff                          # (BB, NC, SB) f32
        validf = jnp.where(valid, 1.0, 0.0)       # (BB, GC, SB) f32

        if GC == NC:
            mask_full = validf
        else:
            # channel broadcast of the mask (sublane broadcast), f32 add is cheap/safe
            mask_full = validf + jnp.zeros_like(sq)

        # Select (not multiply) so padded-region garbage (inf/nan) is discarded.
        acc_sum[...] += jnp.where(mask_full > 0.0, sq, 0.0)
        acc_cnt[...] += validf

        @pl.when(j == NS - 1)
        def _finalize():
            tot_sq = jnp.sum(acc_sum[...])
            tot_ct = jnp.sum(acc_cnt[...]) * float(mult)
            osum_ref[...] = jnp.full(osum_ref.shape, tot_sq, dtype=jnp.float32)
            ocnt_ref[...] = jnp.full(ocnt_ref.shape, tot_ct, dtype=jnp.float32)

    return kernel


def distance_loss(student, teacher, gt):
    assert student.ndim == teacher.ndim == gt.ndim, "KL_DIV: inconsistent dimensions"

    if teacher.shape != student.shape:
        teacher = jnp.broadcast_to(teacher, student.shape)   # glue; usually a no-op

    shape = student.shape
    if student.ndim >= 3:
        NB, NC = int(shape[0]), int(shape[1])
        S = int(math.prod(shape[2:]))
        s3 = student.reshape(NB, NC, S)
        t3 = teacher.reshape(NB, NC, S)
        if gt.shape == shape:
            g3, GC = gt.reshape(NB, NC, S), NC
        elif (gt.shape[0] == NB and gt.shape[1] == 1
              and tuple(gt.shape[2:]) == tuple(shape[2:])):
            # Channel broadcast handled inside the kernel: gt stays at its
            # original (B, 1, spatial) size -> no HBM expansion of gt.
            g3, GC = gt.reshape(NB, 1, S), 1
        else:
            g3, GC = jnp.broadcast_to(gt, shape).reshape(NB, NC, S), NC
    else:
        NB, NC, GC = 1, 1, 1
        S = int(student.size)
        s3 = student.reshape(1, 1, S)
        t3 = teacher.reshape(1, 1, S)
        g3 = jnp.broadcast_to(gt, shape).reshape(1, 1, S)

    mult = NC // GC
    itemsize = max(s3.dtype.itemsize, t3.dtype.itemsize)
    bytes_per_b = NC * S * itemsize

    if bytes_per_b >= _TARGET_BLOCK_BYTES or NB == 1:
        # One batch element per block; tile the spatial axis into big lane-dense blocks.
        BB = 1
        sb = max(_LANES, (_TARGET_BLOCK_BYTES // (NC * itemsize)) // _LANES * _LANES)
        if S <= sb:
            SB, NS, tail = S, 1, False
        else:
            SB, NS, tail = sb, -(-S // sb), (S % sb) != 0
    else:
        # Small per-batch slice: group several batch elements per block instead.
        SB, NS, tail = S, 1, False
        cap = _TARGET_BLOCK_BYTES // bytes_per_b
        if NB >= 2:
            cap = min(cap, NB // 2)   # keep >= 2 parallel blocks for megacore / v7x
        BB = _largest_divisor_leq(NB, cap)

    grid = (NB // BB, NS)
    kernel = _make_kernel(NC, GC, S, SB, NS, mult, tail)

    out_shape = (jax.ShapeDtypeStruct((grid[0], 8, _LANES), jnp.float32),
                 jax.ShapeDtypeStruct((grid[0], 8, _LANES), jnp.float32))

    osum, ocnt = pl.pallas_call(
        kernel,
        out_shape=out_shape,
        grid_spec=pltpu.PrefetchScalarGridSpec(
            num_scalar_prefetch=0,
            grid=grid,
            in_specs=[
                pl.BlockSpec((BB, NC, SB), lambda b, j: (b, 0, j)),
                pl.BlockSpec((BB, NC, SB), lambda b, j: (b, 0, j)),
                pl.BlockSpec((BB, GC, SB), lambda b, j: (b, 0, j)),
            ],
            out_specs=(
                pl.BlockSpec((1, 8, _LANES), lambda b, j: (b, 0, 0)),
                pl.BlockSpec((1, 8, _LANES), lambda b, j: (b, 0, 0)),
            ),
            scratch_shapes=[
                pltpu.VMEM((BB, NC, SB), jnp.float32),   # masked squared-diff accumulator
                pltpu.VMEM((BB, GC, SB), jnp.float32),   # valid-count accumulator
            ],
        ),
        compiler_params=pltpu.CompilerParams(
            dimension_semantics=("parallel", "arbitrary"),
            vmem_limit_bytes=_VMEM_LIMIT_BYTES,
        ),
    )(s3, t3, g3)

    total_sum = jnp.sum(osum[:, 0, 0])
    total_cnt = jnp.sum(ocnt[:, 0, 0])
    out_dtype = jnp.promote_types(student.dtype, teacher.dtype)
    # 0/0 -> nan, matching torch.mean() over an empty selection.
    return (total_sum / total_cnt).astype(out_dtype)


if __name__ == "__main__":
    key = jax.random.PRNGKey(0)
    k1, k2, k3 = jax.random.split(key, 3)

    B, C, H, W = 2, 4, 16, 16
    student = jax.random.normal(k1, (B, C, H, W), dtype=jnp.float32)
    teacher = jax.random.normal(k2, (B, C, H, W), dtype=jnp.float32)
    # gt has a single channel expanded over C (like a depth gt map);
    # roughly half the pixels are "valid" (> 0).
    gt = jax.random.normal(k3, (B, 1, H, W), dtype=jnp.float32)

    loss = distance_loss(student, teacher, gt)
    loss = jax.block_until_ready(loss)

    # Reference check in plain JAX (same math as the torch module).
    mask = jnp.broadcast_to(gt > 0, student.shape)
    diff = student - teacher
    ref = jnp.sum(jnp.where(mask, diff * diff, 0.0)) / jnp.sum(mask)

    assert jnp.allclose(loss, ref, rtol=1e-5, atol=1e-6), (loss, ref)
    print("KERNEL_OK")
</pallas_src>

<mosaic_0001>
module attributes {stable_mosaic.version = 11 : i64} {
  func.func @kernel(%arg0: i32, %arg1: i32, %arg2: memref<1x4x256xf32, #tpu.memory_space<vmem>>, %arg3: memref<1x4x256xf32, #tpu.memory_space<vmem>>, %arg4: memref<1x1x256xf32, #tpu.memory_space<vmem>>, %arg5: memref<1x8x128xf32, #tpu.memory_space<vmem>>, %arg6: memref<1x8x128xf32, #tpu.memory_space<vmem>>, %arg7: memref<1x4x256xf32, #tpu.memory_space<vmem>>, %arg8: memref<1x1x256xf32, #tpu.memory_space<vmem>>) attributes {dimension_semantics = [#tpu.dimension_semantics<parallel>, #tpu.dimension_semantics<arbitrary>], iteration_bounds = array<i64: 2, 1>, scalar_prefetch = 0 : i64, scratch_operands = 2 : i64, tpu.core_type = #tpu.core_type<tc>, window_params = [{transform_indices = @transform_0, window_bounds = array<i64: 1, 4, 256>}, {transform_indices = @transform_1, window_bounds = array<i64: 1, 4, 256>}, {transform_indices = @transform_2, window_bounds = array<i64: 1, 1, 256>}, {transform_indices = @transform_3, window_bounds = array<i64: 1, 8, 128>}, {transform_indices = @transform_4, window_bounds = array<i64: 1, 8, 128>}]} {
    %c0_i32 = arith.constant 0 : i32
    %0 = arith.cmpi eq, %arg1, %c0_i32 : i32
    %1 = arith.extui %0 : i1 to i32
    %c0_i32_0 = arith.constant 0 : i32
    %2 = arith.cmpi ne, %1, %c0_i32_0 : i32
    scf.if %2 {
      %cst_28 = arith.constant 0.000000e+00 : f32
      %29 = vector.broadcast %cst_28 : f32 to vector<1x4x256xf32>
      %c0_29 = arith.constant 0 : index
      %c0_30 = arith.constant 0 : index
      %c0_31 = arith.constant 0 : index
      %30 = vector.load %arg7[%c0_29, %c0_30, %c0_31] : memref<1x4x256xf32, #tpu.memory_space<vmem>>, vector<1x4x256xf32>
      tpu.vector_store %arg7[%c0_29, %c0_30, %c0_31], %29 {strides = array<i32>} : memref<1x4x256xf32, #tpu.memory_space<vmem>>, vector<1x4x256xf32>,
      %cst_32 = arith.constant 0.000000e+00 : f32
      %31 = vector.broadcast %cst_32 : f32 to vector<1x1x256xf32>
      %c0_33 = arith.constant 0 : index
      %c0_34 = arith.constant 0 : index
      %c0_35 = arith.constant 0 : index
      %32 = vector.load %arg8[%c0_33, %c0_34, %c0_35] : memref<1x1x256xf32, #tpu.memory_space<vmem>>, vector<1x1x256xf32>
      tpu.vector_store %arg8[%c0_33, %c0_34, %c0_35], %31 {strides = array<i32>} : memref<1x1x256xf32, #tpu.memory_space<vmem>>, vector<1x1x256xf32>,
    } else {
    }
    %c0 = arith.constant 0 : index
    %c0_1 = arith.constant 0 : index
    %c0_2 = arith.constant 0 : index
    %3 = vector.load %arg2[%c0, %c0_1, %c0_2] : memref<1x4x256xf32, #tpu.memory_space<vmem>>, vector<1x4x256xf32>
    %c0_3 = arith.constant 0 : index
    %c0_4 = arith.constant 0 : index
    %c0_5 = arith.constant 0 : index
    %4 = vector.load %arg3[%c0_3, %c0_4, %c0_5] : memref<1x4x256xf32, #tpu.memory_space<vmem>>, vector<1x4x256xf32>
    %c0_6 = arith.constant 0 : index
    %c0_7 = arith.constant 0 : index
    %c0_8 = arith.constant 0 : index
    %5 = vector.load %arg4[%c0_6, %c0_7, %c0_8] : memref<1x1x256xf32, #tpu.memory_space<vmem>>, vector<1x1x256xf32>
    %cst = arith.constant 0.000000e+00 : f32
    %6 = vector.broadcast %cst : f32 to vector<1x1x256xf32>
    %7 = arith.cmpf ogt, %5, %6 : vector<1x1x256xf32>
    %8 = arith.subf %3, %4 : vector<1x4x256xf32>
    %9 = arith.mulf %8, %8 : vector<1x4x256xf32>
    %cst_9 = arith.constant 1.000000e+00 : f32
    %cst_10 = arith.constant 0.000000e+00 : f32
    %10 = vector.broadcast %cst_9 : f32 to vector<1x1x256xf32>
    %11 = vector.broadcast %cst_10 : f32 to vector<1x1x256xf32>
    %12 = arith.select %7, %10, %11 : vector<1x1x256xi1>, vector<1x1x256xf32>
    %cst_11 = arith.constant 0.000000e+00 : f32
    %13 = vector.broadcast %cst_11 : f32 to vector<1x4x256xf32>
    %14 = vector.broadcast %12 : vector<1x1x256xf32> to vector<1x4x256xf32>
    %15 = arith.addf %14, %13 : vector<1x4x256xf32>
    %c0_12 = arith.constant 0 : index
    %c0_13 = arith.constant 0 : index
    %c0_14 = arith.constant 0 : index
    %16 = vector.load %arg7[%c0_12, %c0_13, %c0_14] : memref<1x4x256xf32, #tpu.memory_space<vmem>>, vector<1x4x256xf32>
    %cst_15 = arith.constant 0.000000e+00 : f32
    %17 = vector.broadcast %cst_15 : f32 to vector<1x4x256xf32>
    %18 = arith.cmpf ogt, %15, %17 : vector<1x4x256xf32>
    %cst_16 = arith.constant 0.000000e+00 : f32
    %19 = vector.broadcast %cst_16 : f32 to vector<1x4x256xf32>
    %20 = arith.select %18, %9, %19 : vector<1x4x256xi1>, vector<1x4x256xf32>
    %21 = arith.addf %16, %20 : vector<1x4x256xf32>
    %c0_17 = arith.constant 0 : index
    %c0_18 = arith.constant 0 : index
    %c0_19 = arith.constant 0 : index
    %22 = vector.load %arg7[%c0_17, %c0_18, %c0_19] : memref<1x4x256xf32, #tpu.memory_space<vmem>>, vector<1x4x256xf32>
    tpu.vector_store %arg7[%c0_17, %c0_18, %c0_19], %21 {strides = array<i32>} : memref<1x4x256xf32, #tpu.memory_space<vmem>>, vector<1x4x256xf32>,
    %c0_20 = arith.constant 0 : index
    %c0_21 = arith.constant 0 : index
    %c0_22 = arith.constant 0 : index
    %23 = vector.load %arg8[%c0_20, %c0_21, %c0_22] : memref<1x1x256xf32, #tpu.memory_space<vmem>>, vector<1x1x256xf32>
    %24 = arith.addf %23, %12 : vector<1x1x256xf32>
    %c0_23 = arith.constant 0 : index
    %c0_24 = arith.constant 0 : index
    %c0_25 = arith.constant 0 : index
    %25 = vector.load %arg8[%c0_23, %c0_24, %c0_25] : memref<1x1x256xf32, #tpu.memory_space<vmem>>, vector<1x1x256xf32>
    tpu.vector_store %arg8[%c0_23, %c0_24, %c0_25], %24 {strides = array<i32>} : memref<1x1x256xf32, #tpu.memory_space<vmem>>, vector<1x1x256xf32>,
    %c0_i32_26 = arith.constant 0 : i32
    %26 = arith.cmpi eq, %arg1, %c0_i32_26 : i32
    %27 = arith.extui %26 : i1 to i32
    %c0_i32_27 = arith.constant 0 : i32
    %28 = arith.cmpi ne, %27, %c0_i32_27 : i32
    scf.if %28 {
      %c0_28 = arith.constant 0 : index
      %c0_29 = arith.constant 0 : index
      %c0_30 = arith.constant 0 : index
      %29 = vector.load %arg7[%c0_28, %c0_29, %c0_30] : memref<1x4x256xf32, #tpu.memory_space<vmem>>, vector<1x4x256xf32>
      %30 = vector.shape_cast %29 : vector<1x4x256xf32> to vector<1x1x4x256xf32>
      %cst_31 = arith.constant dense<0.000000e+00> : vector<1xf32>
      %31 = vector.multi_reduction <add>, %30, %cst_31 [1, 2, 3] : vector<1x1x4x256xf32> to vector<1xf32>
      %32 = vector.shape_cast %31 : vector<1xf32> to vector<1x1x1x1xf32>
      %33 = vector.extract %32[0, 0, 0, 0] : f32 from vector<1x1x1x1xf32>
      %c0_32 = arith.constant 0 : index
      %c0_33 = arith.constant 0 : index
      %c0_34 = arith.constant 0 : index
      %34 = vector.load %arg8[%c0_32, %c0_33, %c0_34] : memref<1x1x256xf32, #tpu.memory_space<vmem>>, vector<1x1x256xf32>
      %35 = vector.shape_cast %34 : vector<1x1x256xf32> to vector<1x1x1x256xf32>
      %cst_35 = arith.constant dense<0.000000e+00> : vector<1xf32>
      %36 = vector.multi_reduction <add>, %35, %cst_35 [1, 2, 3] : vector<1x1x1x256xf32> to vector<1xf32>
      %37 = vector.shape_cast %36 : vector<1xf32> to vector<1x1x1x1xf32>
      %38 = vector.extract %37[0, 0, 0, 0] : f32 from vector<1x1x1x1xf32>
      %cst_36 = arith.constant 4.000000e+00 : f32
      %39 = arith.mulf %38, %cst_36 : f32
      %40 = vector.broadcast %33 : f32 to vector<1x8x128xf32>
      %c0_37 = arith.constant 0 : index
      %c0_38 = arith.constant 0 : index
      %c0_39 = arith.constant 0 : index
      %41 = vector.load %arg5[%c0_37, %c0_38, %c0_39] : memref<1x8x128xf32, #tpu.memory_space<vmem>>, vector<1x8x128xf32>
      tpu.vector_store %arg5[%c0_37, %c0_38, %c0_39], %40 {strides = array<i32>} : memref<1x8x128xf32, #tpu.memory_space<vmem>>, vector<1x8x128xf32>,
      %42 = vector.broadcast %39 : f32 to vector<1x8x128xf32>
      %c0_40 = arith.constant 0 : index
      %c0_41 = arith.constant 0 : index
      %c0_42 = arith.constant 0 : index
      %43 = vector.load %arg6[%c0_40, %c0_41, %c0_42] : memref<1x8x128xf32, #tpu.memory_space<vmem>>, vector<1x8x128xf32>
      tpu.vector_store %arg6[%c0_40, %c0_41, %c0_42], %42 {strides = array<i32>} : memref<1x8x128xf32, #tpu.memory_space<vmem>>, vector<1x8x128xf32>,
    } else {
    }
    return
  }
  func.func @transform_0(%arg0: i32, %arg1: i32) -> (i32, i32, i32) {
    %c0_i32 = arith.constant 0 : i32
    %c0_i32_0 = arith.constant 0 : i32
    return %arg0, %c0_i32, %arg1 : i32, i32, i32
  }
  func.func @transform_1(%arg0: i32, %arg1: i32) -> (i32, i32, i32) {
    %c0_i32 = arith.constant 0 : i32
    %c0_i32_0 = arith.constant 0 : i32
    return %arg0, %c0_i32, %arg1 : i32, i32, i32
  }
  func.func @transform_2(%arg0: i32, %arg1: i32) -> (i32, i32, i32) {
    %c0_i32 = arith.constant 0 : i32
    %c0_i32_0 = arith.constant 0 : i32
    return %arg0, %c0_i32, %arg1 : i32, i32, i32
  }
  func.func @transform_3(%arg0: i32, %arg1: i32) -> (i32, i32, i32) {
    %c0_i32 = arith.constant 0 : i32
    %c0_i32_0 = arith.constant 0 : i32
    %c0_i32_1 = arith.constant 0 : i32
    return %arg0, %c0_i32, %c0_i32_0 : i32, i32, i32
  }
  func.func @transform_4(%arg0: i32, %arg1: i32) -> (i32, i32, i32) {
    %c0_i32 = arith.constant 0 : i32
    %c0_i32_0 = arith.constant 0 : i32
    %c0_i32_1 = arith.constant 0 : i32
    return %arg0, %c0_i32, %c0_i32_0 : i32, i32, i32
  }
}

</mosaic_0001>

<bundles_post_ra>
// kernel: tpu_custom_call.1
= control target key start
LH: loop header
LB: loop body
LE: loop exit
PB: predicated region body
PF: predicated region fallthrough
CT: control target
= control target key end

     0   :  { %s1188_s0 = inlined_call_operand.hbm [shape: f32[2,4,256], index: 0, kind: input, shape index: {}]   ;;  %s1189_s1 = inlined_call_operand.hbm [shape: f32[2,4,256], index: 1, kind: input, shape index: {}]   ;;  %s1190_s2 = inlined_call_operand.hbm [shape: f32[2,1,256], index: 2, kind: input, shape index: {}]   ;;  %s1191_s3 = inlined_call_operand.hbm [shape: f32[2,8,128], index: 3, kind: output, shape index: {0}]   ;;  %s1192_s4 = inlined_call_operand.hbm [shape: f32[2,8,128], index: 4, kind: output, shape index: {1}]  }
   0x1   :  { %1194 = sst [smem:[#allocation19_spill]] %s1189_s1 }
   0x2   :  { %10 = vsyncpa [#allocation5], 0 }
   0x3   :  { %12 = vsyncpa [#allocation5 + $0x1], 0 }
   0x4   :  { %13 = vsyncpa [#allocation8], 0 }
   0x5   :  { %15 = vsyncpa [#allocation8 + $0x1], 0 }
   0x6   :  { %16 = vsyncpa [#allocation6], 0 }
   0x7   :  { %18 = vsyncpa [#allocation6 + $0x1], 0 }
   0x8   :  { %19 = vsyncpa [#allocation12], 0 }
   0x9   :  { %21 = vsyncpa [#allocation12 + $0x1], 0  ;;  %s962_s15 = smov 0   ;;  %s964_s16 = smov 0  }
   0xa   :  { %s966_s17 = smov 0   ;;  %s968_s18 = smov 0  }
   0xb   :  { %s970_s19 = smov 0   ;;  %s972_s20 = smov 0  }
   0xc LB: > { %s993_s21 = sadd.s32 4294967295, %s929_s20   ;;  %s621_s22 = sadd.s32 4294967294, %s929_s20   ;;  %s929_s20 = sphi %s972_s20, %s27_s20   ;;  %s925_s19 = sphi %s970_s19, %s1213_s19   ;;  %s921_s18 = sphi %s968_s18, %s1212_s18   ;;  %s917_s17 = sphi %s966_s17, %s1211_s17   ;;  %s913_s16 = sphi %s964_s16, %s1210_s16   ;;  %s909_s15 = sphi %s962_s15, %s1209_s15  }
   0xd   : > { %s39_s23 = sadd.s32 1, %s925_s19  ;;  %s48_s24 = sadd.s32 1, %s917_s17 }
   0xe   : > { %p41_p0 = scmp.ge.s32.totalorder %s39_s23, 2  ;;  %p55_p1 = scmp.ne.s32.totalorder %s917_s17, %s913_s16 }
   0xf   : > { %p56_p2 = scmp.eq.s32.totalorder %s929_s20, 0  ;;  %p61_p3 = scmp.ne.s32.totalorder %s913_s16, %s909_s15 }
  0x10   : > { %s1215_s23 = smov (%p41_p0, %s39_s23), 0  ;;  %p62_p5 = scmp.eq.s32.totalorder %s993_s21, 0 }
  0x11   : > { %1195 = sst [smem:[#allocation17_spill]] %s1215_s23  ;;  %p1005_p4 = por %p56_p2, %p55_p1 }
  0x12   : > { %s43_s26 = ssub.s32 %s925_s19, %s1215_s23  ;;  %p141_p6 = scmp.eq.s32.totalorder %s993_s21, 1 }
  0x13   : > { %p46_p7 = scmp.eq.s32.totalorder %s43_s26, 0  ;;  %p1013_p8 = por %p62_p5, %p61_p3 }
  0x14   : > { %p1017_p9 = por %p141_p6, %p55_p1  ;;  %p147_p10 = scmp.eq.s32.totalorder %s621_s22, 1 }
  0x15   : > { %s1022_s29 = scalar_select %p46_p7, %s917_s17, %s48_s24  }
  0x16   : > { %p1024_p11 = por %p147_p10, %p61_p3  ;;  %p680_p13 = scmp.lt.s32.totalorder %s929_s20, 2 }
  0x17   : > { %1199 = sst [smem:[#allocation18_spill]] %s1022_s29  ;;  %s1031_s5 = sand.u32 1, %s917_s17  }
  0x18   : > { %s624_s6 = sshll.u32 %s1031_s5, 3  ;;  %s645_s7 = sshll.u32 %s925_s19, 7 }
  0x19   : > { %p1037_p0 = pnand %p680_p13, %p1005_p4  ;;  %s214_s9 = sand.u32 1, %s929_s20  }
  0x1a   : > { %s1202_s1 = sld [smem:[#allocation19_spill]]  ;;  %s218_s13 = scalar_lea.vmem [#allocation7], %s624_s6 }
  0x1b   : > { %s228_s14 = sshll.u32 %s218_s13, 4  ;;  %p633_p1 = scmp.ge.s32.totalorder %s929_s20, 1  ;;  %s229_s14 = int_to_ptr.vmem [resolvable:$true] %s228_s14 }
  0x1c   : > { %p254_p2 = scmp.lt.s32.totalorder %s929_s20, 3  ;;  %s1047_s22 = scalar_lea.sflag [#allocation8], %s214_s9 }
  0x1d   : > { %p733_p3 = pneg %p1037_p0  ;;  %s744_s24 = scalar_lea.vmem %s229_s14, 128 }
  0x1e   : > { %p745_p4 = scmp.ne.s32.totalorder %s229_s14, %s744_s24  ;;  %s931_s25 = smov [#allocation7]  }
  0x1f   : > { %s749_s26 = sshll.u32 %s931_s25, 4  ;;  %s750_s26 = int_to_ptr.vmem [resolvable:$false] %s749_s26 }
  0x20   : > { %s226_s12 = scalar_lea.hbm %s1202_s1, %s645_s7  ;;  %p747_p5 = pnand %p745_p4, %p733_p3 }
  0x21   : > { %s751_s10 = scalar_lea.vmem %s750_s26, 256  ;;  %p752_p7 = scmp.lt.s32.totalorder %s229_s14, %s750_s26 }
  0x22   : > { %p748_p6 = pneg %p747_p5  ;;  %p753_p10 = scmp.lt.s32.totalorder %s751_s10, %s744_s24 }
  0x24   : > { %p754_p13 = por %p753_p10, %p752_p7 }
  0x26   : > { %p755_p12 = pnand %p754_p13, %p748_p6 }
  0x28   : > { %758 = shalt.err (!%p755_p12)
}
  0x29   : > { %669 = dma.hbm_to_vmem [thread:$0]  (!%p1037_p0), %s226_s12, 128, %s229_s14, %s1047_s22  }
  0x2a   : > { %p1061_p4 = pnand %p633_p1, %p254_p2  ;;  %s205_s24 = scalar_lea.hbm %s1188_s0, %s645_s7 }
  0x2b   : > { %s197_s25 = scalar_lea.vmem [#allocation4], %s624_s6  ;;  %s630_s10 = sshll.u32 %s1031_s5, 1 }
  0x2c   : > { %s207_s26 = sshll.u32 %s197_s25, 4  ;;  %s194_s1 = scalar_lea.sflag [#allocation5], %s1031_s5  ;;  %s208_s26 = int_to_ptr.vmem [resolvable:$true] %s207_s26 }
  0x2d   : > { %s772_s23 = scalar_lea.vmem %s208_s26, 128  ;;  %s932_s12 = smov [#allocation4]  }
  0x2e   : > { %p773_p12 = scmp.ne.s32.totalorder %s208_s26, %s772_s23  ;;  %s777_s14 = sshll.u32 %s932_s12, 4  ;;  %s778_s14 = int_to_ptr.vmem [resolvable:$false] %s777_s14 }
  0x2f   : > { %s779_s29 = scalar_lea.vmem %s778_s14, 256  ;;  %p780_p1 = scmp.lt.s32.totalorder %s208_s26, %s778_s14 }
  0x30   : > { %p775_p5 = pnand %p773_p12, %p733_p3  ;;  %p781_p2 = scmp.lt.s32.totalorder %s779_s29, %s772_s23 }
  0x32   : > { %p776_p6 = pneg %p775_p5  ;;  %p782_p7 = por %p781_p2, %p780_p1 }
  0x34   : > { %p783_p10 = pnand %p782_p7, %p776_p6 }
  0x36   : > { %786 = shalt.err (!%p783_p10)
}
  0x37   : > { %666 = dma.hbm_to_vmem [thread:$0]  (!%p1037_p0), %s205_s24, 128, %s208_s26, %s194_s1  }
  0x38   : > { %s647_s5 = sshll.u32 %s925_s19, 5  ;;  %s239_s6 = scalar_lea.vmem [#allocation9], %s630_s10 }
  0x39   : > { %s249_s7 = sshll.u32 %s239_s6, 4  ;;  %s247_s25 = scalar_lea.hbm %s1190_s2, %s647_s5  ;;  %s250_s7 = int_to_ptr.vmem [resolvable:$true] %s249_s7 }
  0x3a   : > { %s800_s12 = scalar_lea.vmem %s250_s7, 32  ;;  %s933_s23 = smov [#allocation9]  }
  0x3b   : > { %p801_p13 = scmp.ne.s32.totalorder %s250_s7, %s800_s12  ;;  %s805_s29 = sshll.u32 %s933_s23, 4  ;;  %s806_s29 = int_to_ptr.vmem [resolvable:$false] %s805_s29 }
  0x3c   : > { %s807_s14 = scalar_lea.vmem %s806_s29, 64  ;;  %p808_p6 = scmp.lt.s32.totalorder %s250_s7, %s806_s29 }
  0x3d   : > { %p803_p12 = pnand %p801_p13, %p733_p3  ;;  %p809_p1 = scmp.lt.s32.totalorder %s807_s14, %s800_s12 }
  0x3f   : > { %p804_p5 = pneg %p803_p12  ;;  %p810_p2 = por %p809_p1, %p808_p6 }
  0x41   : > { %p811_p7 = pnand %p810_p2, %p804_p5 }
  0x43   : > { %814 = shalt.err (!%p811_p7)
}
  0x44   : > { %672 = dma.hbm_to_vmem [thread:$0]  (!%p1037_p0), %s247_s25, 32, %s250_s7, %s1047_s22  }
  0x45   : > { %258 = sbr.rel (%p1061_p4) target bundleno = 331 (0x14b), region = 32  ;;  %s1088_s1 = sand.u32 (!%p1061_p4), 1, %s913_s16  }
  0x46   : > { %s1091_s24 = sshll.u32 (!%p1061_p4), %s1088_s1, 3  ;;  %s261_s26 = scalar_lea.sflag (!%p1061_p4), [#allocation5], %s1088_s1 }
  0x47   : > { %s264_s10 = scalar_lea.vmem (!%p1061_p4), [#allocation4], %s1091_s24 }
  0x4a   : > { %892 = dma.done.wait (%p1013_p8), %s261_s26, 128  }
  0x4b   : > { %894 = vsyncadd (%p1013_p8), %s261_s26, 4294967168  ;;  %s269_s8 = sand.u32 1, %s993_s21   ;;  %s273_s9 = scalar_lea.vmem [#allocation7], %s1091_s24 }
  0x4c   : > { %s270_s22 = scalar_lea.sflag [#allocation8], %s269_s8 }
  0x4d   : > { %896 = dma.done.wait (%p1013_p8), %s270_s22, 160  }
  0x4e   : > { %898 = vsyncadd (%p1013_p8), %s270_s22, 4294967136  ;;  %v330_v0 = vlaneseq  ;;  %s636_s5 = sshll.u32 %s1088_s1, 1  ;;  %v934_v3 = vmov 0.0   ;;  %v335_v6 = vld [vmem:[%s264_s10] sm:$0xff]  ;;  %v336_v7 = vld [vmem:[%s273_s9] sm:$0xff]  ;;  %vm383_vm4 = vcmask 1043456  }
  0x4f   : > { %s282_s21 = scalar_lea.vmem [#allocation9], %s636_s5  ;;  %v339_v9 = vsub.f32 %v335_v6, %v336_v7  ;;  %vm408_vm5 = vcmask 1040384   ;;  %s641_s27 = sshll.u32 %s921_s18, 7 }
  0x50   : > { %vm1106_vm0 = vcmp.lt.s32.totalorder %v330_v0, 256  ;;  %v344_v2 = vshrl.u32 %v330_v0, 7  ;;  %v337_v8 = vld [vmem:[%s282_s21] sm:$0x3]  ;;  %s314_s6 = scalar_lea.vmem [#allocation10], %s1091_s24  ;;  %s1121_s25 = scalar_lea.hbm %s1191_s3, %s641_s27 }
  0x51   : > { %334 = vst.msk [vmem:[#allocation3] sm:$0x3] %vm1106_vm0, %v934_v3  ;;  %vm338_vm1 = vcmp.gt.f32.partialorder %v337_v8, 0.0  ;;  %v340_v11 = vmul.f32 %v339_v9, %v339_v9  ;;  %s445_s7 = sshll.u32 %s314_s6, 4  ;;  %s427_s23 = scalar_lea.sflag [#allocation6], %s1088_s1  ;;  %s446_s7 = int_to_ptr.vmem [resolvable:$true] %s445_s7 }
  0x52   : > { %v345_v4 = vsub.s32 0, %v344_v2  ;;  %v349_v5 = vsub.s32 1, %v344_v2  ;;  %v341_v10 = vsel %vm338_vm1, 1.0, %v934_v3  ;;  %s815_s29 = scalar_lea.vmem %s446_s7, 128  ;;  %s935_s14 = smov [#allocation10]  }
  0x53   : > { %v359_v16 = vcombine.high %v340_v11, %v340_v11  ;;  %p816_p8 = scmp.ne.s32.totalorder %s446_s7, %s815_s29  ;;  %s819_s26 = sshll.u32 %s935_s14, 4  ;;  %s820_s26 = int_to_ptr.vmem [resolvable:$false] %s819_s26 }
  0x54   : > { %v346_v12 = vrot.slane %v341_v10, %v345_v4  ;;  %v350_v13 = vrot.slane %v341_v10, %v349_v5  ;;  %s821_s10 = scalar_lea.vmem %s820_s26, 256  ;;  %p822_p4 = scmp.lt.s32.totalorder %s446_s7, %s820_s26 }
  0x55   : > { %p817_p0 = pnand %p816_p8, %p1017_p9  ;;  %p823_p10 = scmp.lt.s32.totalorder %s821_s10, %s815_s29 }
  0x56   : > { %vm356_vm2 = vcmp.gt.f32.partialorder %v346_v12, 0.0  ;;  %vm357_vm3 = vcmp.gt.f32.partialorder %v350_v13, 0.0 }
  0x57   : > { %v361_v17 = vsel %vm356_vm2, %v340_v11, 0.0  ;;  %v362_v18 = vsel %vm357_vm3, %v359_v16, 0.0  ;;  %p818_p3 = pneg %p817_p0  ;;  %p824_p13 = por %p823_p10, %p822_p4 }
  0x58   : > { %v369_v14 = vld [vmem:[#allocation3] sm:$0x3]  ;;  %v365_v19 = vcombine.low %v361_v17, %v362_v18  ;;  %v648_v20 = vcombine.low %v362_v18, %v362_v18 }
  0x59   : > { %v370_v15 = vadd.f32 %v369_v14, %v341_v10  ;;  %p825_p12 = pnand %p824_p13, %p818_p3 }
  0x5a   : > { %v384_v21 = vsel %vm383_vm4, %v365_v19, 0.0  ;;  %v385_v22 = vsel %vm383_vm4, %v648_v20, 0.0 }
  0x5b   : > { %375 = vst.msk [vmem:[#allocation3] sm:$0x3] %vm1106_vm0, %v370_v15  ;;  %v386_v23 = vadd.f32 %v385_v22, %v384_v21 }
  0x5d   : > { %387 = vadd.xlane.f32.xlu0 %v386_v23 }
  0x62   : > { %v396_v24 = vld [vmem:[#allocation3] sm:$0x3] }
  0x63   : > { %v401_v25 = vrot.slane %v396_v24, %v345_v4  ;;  %v405_v26 = vrot.slane %v396_v24, %v349_v5 }
  0x65   : > { %v409_v27 = vsel %vm408_vm5, %v401_v25, 0.0  ;;  %v410_v28 = vsel %vm408_vm5, %v405_v26, 0.0 }
  0x66   : > { %v411_v29 = vadd.f32 %v410_v28, %v409_v27 }
  0x68   : > { %412 = vadd.xlane.f32.xlu0 %v411_v29 }
  0xe6   : > { %v388_v30 = vpop.xlane.xlu0 %387 }
  0xe7   : > { %v389_v31 = vrot.slane %v388_v30, 4 }
  0xe9   : > { %v390_v32 = vadd.f32 %v389_v31, %v388_v30 }
  0xeb   : > { %v391_v33 = vrot.slane %v390_v32, 2 }
  0xed   : > { %v392_v36 = vadd.f32 %v391_v33, %v390_v32 }
  0xef   : > { %v393_v38 = vrot.slane %v392_v36, 1 }
  0xf1   : > { %v413_v34 = vpop.xlane.xlu0 %412  ;;  %v394_v40 = vadd.f32 %v393_v38, %v392_v36 }
  0xf2   : > { %v414_v35 = vrot.slane %v413_v34, 4 }
  0xf3   : > { %649 = vpush %v394_v40 }
  0xf4   : > { %v415_v37 = vadd.f32 %v414_v35, %v413_v34 }
  0xf6   : > { %v416_v39 = vrot.slane %v415_v37, 2 }
  0xf8   : > { %v417_v41 = vadd.f32 %v416_v39, %v415_v37 }
  0xfa   : > { %v418_v42 = vrot.slane %v417_v41, 1 }
  0xfc   : > { %v419_v43 = vadd.f32 %v418_v42, %v417_v41 }
  0xfe   : > { %651 = vpush %v419_v43 }
 0x124   : > { %s650_s12 = spop %649 }
 0x125   : > { %v422_v44 = vstv %s650_s12 }
 0x126   : > { %423 = vst [vmem:[%s314_s6] sm:$0xff] %v422_v44 }
 0x127   : > { %828 = shalt.err (!%p825_p12)
}
 0x128   : > { %s829_s8 = scalar_lea.hbm %s1121_s25, 128  ;;  %s833_s5 = scalar_lea.hbm %s1191_s3, 256 }
 0x129   : > { %p830_p5 = scmp.ne.s32.totalorder %s1121_s25, %s829_s8  ;;  %p834_p2 = scmp.lt.s32.totalorder %s1121_s25, %s1191_s3 }
 0x12a   : > { %p835_p7 = scmp.lt.s32.totalorder %s833_s5, %s829_s8 }
 0x12b   : > { %p831_p6 = pnand %p830_p5, %p1017_p9 }
 0x12c   : > { %p836_p8 = por %p835_p7, %p834_p2 }
 0x12d   : > { %p832_p1 = pneg %p831_p6 }
 0x12f   : > { %p837_p0 = pnand %p836_p8, %p832_p1 }
 0x131   : > { %840 = shalt.err (!%p837_p0)
}
 0x132   : > { %659 = dma.vmem_to_hbm [thread:$0]  (%p1017_p9), %s446_s7, 128, %s1121_s25, %s427_s23  }
 0x133   : > { %s321_s11 = scalar_lea.vmem [#allocation11], %s1091_s24  ;;  %s652_s12 = spop %651 }
 0x134   : > { %s458_s13 = sshll.u32 %s321_s11, 4  ;;  %s421_s29 = smul.f32 4.0, %s652_s12  ;;  %s459_s13 = int_to_ptr.vmem [resolvable:$true] %s458_s13 }
 0x135   : > { %s1146_s10 = scalar_lea.hbm %s1192_s4, %s641_s27  ;;  %s432_s8 = scalar_lea.sflag [#allocation12], %s1088_s1 }
 0x136   : > { %v424_v45 = vstv %s421_s29  ;;  %s841_s22 = scalar_lea.vmem %s459_s13, 128  ;;  %s936_s7 = smov [#allocation11]  }
 0x137   : > { %425 = vst [vmem:[%s321_s11] sm:$0xff] %v424_v45  ;;  %p842_p3 = scmp.ne.s32.totalorder %s459_s13, %s841_s22  ;;  %s845_s24 = sshll.u32 %s936_s7, 4  ;;  %s846_s24 = int_to_ptr.vmem [resolvable:$false] %s845_s24 }
 0x138   : > { %s847_s25 = scalar_lea.vmem %s846_s24, 256  ;;  %p848_p13 = scmp.lt.s32.totalorder %s459_s13, %s846_s24 }
 0x139   : > { %p843_p4 = pnand %p842_p3, %p1017_p9  ;;  %p849_p12 = scmp.lt.s32.totalorder %s847_s25, %s841_s22 }
 0x13b   : > { %p844_p10 = pneg %p843_p4  ;;  %p850_p5 = por %p849_p12, %p848_p13 }
 0x13d   : > { %p851_p6 = pnand %p850_p5, %p844_p10 }
 0x13f   : > { %854 = shalt.err (!%p851_p6)
}
 0x140   : > { %s855_s18 = scalar_lea.hbm %s1146_s10, 128  ;;  %s859_s23 = scalar_lea.hbm %s1192_s4, 256 }
 0x141   : > { %p856_p1 = scmp.ne.s32.totalorder %s1146_s10, %s855_s18  ;;  %p860_p8 = scmp.lt.s32.totalorder %s1146_s10, %s1192_s4 }
 0x142   : > { %p861_p0 = scmp.lt.s32.totalorder %s859_s23, %s855_s18 }
 0x143   : > { %p857_p2 = pnand %p856_p1, %p1017_p9 }
 0x144   : > { %p862_p3 = por %p861_p0, %p860_p8 }
 0x145   : > { %p858_p7 = pneg %p857_p2 }
 0x147   : > { %p863_p4 = pnand %p862_p3, %p858_p7 }
 0x149   : > { %866 = shalt.err (!%p863_p4)
}
 0x14a   : > { %660 = dma.vmem_to_hbm [thread:$0]  (%p1017_p9), %s459_s13, 128, %s1146_s10, %s432_s8  }
 0x14b PF: > { %s470_s21 = sand.u32 1, %s909_s15   ;;  %p1206_p10 = scmp.ge.s32.totalorder %s929_s20, 2 }
 0x14c   : > { %s471_s6 = scalar_lea.sflag [#allocation6], %s470_s21 }
 0x14d   : > { %p674_p13 = pnand %p1206_p10, %p1024_p11 }
 0x14f   : > { %p675_p12 = pneg %p674_p13 }
 0x151   : > { %900 = dma.done.wait (%p675_p12), %s471_s6, 128  }
 0x152   : > { %902 = vsyncadd (%p675_p12), %s471_s6, 4294967168  ;;  %s480_s11 = scalar_lea.sflag [#allocation12], %s470_s21 }
 0x153   : > { %904 = dma.done.wait (%p675_p12), %s480_s11, 128  }
 0x154   : > { %906 = vsyncadd (%p675_p12), %s480_s11, 4294967168  ;;  %s27_s20 = sadd.s32 1, %s929_s20   ;;  %s1207_s28 = sld [smem:[#allocation18_spill]] }
 0x155   : > { %p24_p5 = scmp.ge.s32.totalorder %s27_s20, 4   ;;  %s1208_s13 = sld [smem:[#allocation17_spill]] }
 0x156   : > { %s1209_s15 = smov %s913_s16  ;;  %s1210_s16 = smov %s917_s17 }
 0x157   : > { %s1212_s18 = smov %s925_s19  ;;  %26 = sbr.rel (!%p24_p5) target bundleno = 12 (0xc), region = 126 }
 0x15a   : > { %s1211_s17 = smov %s1207_s28 }
 0x15b   : > { %s1213_s19 = smov %s1208_s13 }
 0x15c   :  { %485 = vsyncpa [#allocation5], 1 }
 0x15d   :  { %487 = vsyncpa [#allocation5 + $0x1], 1 }
 0x15e   :  { %488 = vsyncpa [#allocation8], 1 }
 0x15f   :  { %490 = vsyncpa [#allocation8 + $0x1], 1 }
 0x160   :  { %491 = vsyncpa [#allocation6], 1 }
 0x161   :  { %493 = vsyncpa [#allocation6 + $0x1], 1 }
 0x162   :  { %494 = vsyncpa [#allocation12], 1 }
 0x163   :  { %496 = vsyncpa [#allocation12 + $0x1], 1 }

</bundles_post_ra>
